<compile_context>
chip_gen: v7x
topology: tpu7x:2x2x1
jax: 0.10.0
libtpu: 0.0.40
codegen_flags: <defaults>
</compile_context>

<pallas_src>
import functools
import math
from typing import NamedTuple, Tuple

import jax
import jax.numpy as jnp
from jax.experimental import pallas as pl
from jax.experimental.pallas import tpu as pltpu


def _round_up(x, m):
    return ((x + m - 1) // m) * m


class MLPMeta(NamedTuple):
    layer_dims: Tuple[Tuple[int, int], ...]  # per-layer padded (in, out)
    in_size: int                             # real input width
    out_size: int                            # real output width
    activate_final: bool


def _make_fused_mlp_kernel(layer_dims, activate_final):
    """Whole-MLP kernel: one batch tile, all layers, activations stay in VMEM."""
    num_layers = len(layer_dims)

    def kernel(*refs):
        x_ref = refs[0]                       # (TM, P_in0)  bf16
        w_refs = refs[1:1 + num_layers]       # (p_in_l, p_out_l) bf16, (in,out)
        b_ref = refs[1 + num_layers]          # (Lp8, Pb)    f32
        o_ref = refs[2 + num_layers]          # (TM, P_outL) f32

        h = x_ref[...]                        # bf16 operand for the MXU
        for l, (_, p_out) in enumerate(layer_dims):
            acc = jnp.dot(h, w_refs[l][...],
                          preferred_element_type=jnp.float32)
            acc = acc + b_ref[l:l + 1, :p_out]          # f32 bias epilogue
            if (l < num_layers - 1) or activate_final:
                acc = jnp.maximum(acc, 0.0)             # f32 ReLU epilogue
            if l < num_layers - 1:
                h = acc.astype(jnp.bfloat16)            # bf16 for next MXU op
            else:
                o_ref[...] = acc.astype(o_ref.dtype)

    return kernel


def prepare_mlp_params(params, activate_final=False):
    """One-time packing of PyTorch-layout params for the fused kernel.

    `params` is a list of (w, b) with w in PyTorch (out_features, in_features)
    layout.  Returns (weights, biases, meta):
      * weights: tuple of per-layer bf16 arrays in MXU-native (in, out) layout,
        each zero-padded to (round_up(in,128), round_up(out,128)).
      * biases:  single f32 array (round_up(L,8), max padded out width),
        row l holds layer l's bias (padded lanes are zero).
      * meta:    static shape/config info (hashable, used as a jit static arg).
    """
    num_layers = len(params)
    layer_dims = []
    weights = []
    pb_max = 0
    for (w, b) in params:
        o_s, i_s = w.shape
        p_in = _round_up(i_s, 128)
        p_out = _round_up(o_s, 128)
        layer_dims.append((p_in, p_out))
        pb_max = max(pb_max, p_out)
        w_pad = (jnp.zeros((p_in, p_out), jnp.float32)
                 .at[:i_s, :o_s].set(jnp.asarray(w, jnp.float32).T)
                 .astype(jnp.bfloat16))
        weights.append(w_pad)

    l_pad = _round_up(num_layers, 8)
    biases = jnp.zeros((l_pad, pb_max), jnp.float32)
    for l, (w, b) in enumerate(params):
        o_s = w.shape[0]
        biases = biases.at[l, :o_s].set(jnp.asarray(b, jnp.float32))

    meta = MLPMeta(
        layer_dims=tuple(layer_dims),
        in_size=params[0][0].shape[1],
        out_size=params[-1][0].shape[0],
        activate_final=bool(activate_final),
    )
    return tuple(weights), biases, meta


def _vmem_capacity_bytes():
    try:
        return int(pltpu.get_tpu_info().vmem_capacity_bytes)
    except Exception:
        return 64 * 1024 * 1024  # conservative (v7x per-TensorCore VMEM)


@functools.partial(jax.jit, static_argnames=("meta",))
def mlp_forward(x, weights, biases, meta):
    """Fused MLP forward: y = relu(x @ W_l^T + b_l) per layer (ReLU on hidden
    layers, and on the final layer iff meta.activate_final)."""
    B, in_size = x.shape
    layer_dims = meta.layer_dims
    num_layers = len(layer_dims)
    p_in0 = layer_dims[0][0]
    p_out_last = layer_dims[-1][1]

    # Batch tiling: one tile for small batches; 256-row tiles (marked
    # "parallel" so v7x's two TensorCores split them) for large batches.
    if B <= 256:
        tm = _round_up(B, 16)          # bf16 packs 16 sublanes per vreg
    else:
        tm = 256
    bp = _round_up(B, tm)
    nb = bp // tm

    x_pad = (jnp.zeros((bp, p_in0), jnp.bfloat16)
             .at[:B, :in_size].set(x.astype(jnp.bfloat16)))

    kernel = _make_fused_mlp_kernel(layer_dims, meta.activate_final)

    in_specs = [pl.BlockSpec((tm, p_in0), lambda b: (b, 0))]
    for (p_in, p_out) in layer_dims:
        in_specs.append(pl.BlockSpec((p_in, p_out), lambda b: (0, 0)))
    in_specs.append(pl.BlockSpec(biases.shape, lambda b: (0, 0)))
    out_specs = pl.BlockSpec((tm, p_out_last), lambda b: (b, 0))

    # Advisory cost estimate (per-layer padded sizes, not max-width ones).
    flops = sum(2 * bp * p_in * p_out + 2 * bp * p_out
                for (p_in, p_out) in layer_dims)
    bytes_accessed = (x_pad.size * 2
                      + sum(int(w.size) * 2 for w in weights)
                      + int(biases.size) * 4
                      + bp * p_out_last * 4)

    # VMEM budget from actual buffer sizes (x2 for default double-buffering),
    # clamped to the real per-chip capacity rather than a hard-coded 32 MiB.
    w_bytes = sum(p_in * p_out * 2 for (p_in, p_out) in layer_dims)
    needed = 2 * (tm * p_in0 * 2 + tm * p_out_last * 4
                  + w_bytes + int(biases.size) * 4) + (2 << 20)
    vmem_limit = min(max(needed, 32 << 20),
                     max(16 << 20, int(0.85 * _vmem_capacity_bytes())))

    out_pad = pl.pallas_call(
        kernel,
        out_shape=jax.ShapeDtypeStruct((bp, p_out_last), jnp.float32),
        grid=(nb,),
        in_specs=in_specs,
        out_specs=out_specs,
        compiler_params=pltpu.CompilerParams(
            dimension_semantics=("parallel",),
            vmem_limit_bytes=vmem_limit,
        ),
        cost_estimate=pl.CostEstimate(
            flops=flops, transcendentals=0, bytes_accessed=bytes_accessed),
    )(x_pad, *weights, biases)

    # Slice off batch / feature padding.
    return out_pad[:B, :meta.out_size]


def init_mlp_params(key, input_size, hidden_sizes, output_size):
    """Deterministic init matching SonnetLinear.reset():
    truncated normal in [-2*stddev, 2*stddev], stddev = 1/sqrt(in_size),
    bias 0.  Weights kept in PyTorch (out_features, in_features) layout."""
    params = []
    in_size = input_size
    sizes = list(hidden_sizes) + [output_size]
    for out_size in sizes:
        key, wkey = jax.random.split(key)
        stddev = 1.0 / math.sqrt(in_size)
        w = stddev * jax.random.truncated_normal(
            wkey, -2.0, 2.0, (out_size, in_size), dtype=jnp.float32
        )
        b = jnp.zeros((out_size,), dtype=jnp.float32)
        params.append((w, b))
        in_size = out_size
    return params


if __name__ == "__main__":
    key = jax.random.PRNGKey(0)
    key, xkey = jax.random.split(key)

    batch = 8
    input_size = 16
    hidden_sizes = [32, 32]
    output_size = 8

    x = jax.random.normal(xkey, (batch, input_size), dtype=jnp.float32)
    params = init_mlp_params(key, input_size, hidden_sizes, output_size)

    # One-time weight packing (weight-stationary), then the fused forward.
    weights, biases, meta = prepare_mlp_params(params, activate_final=False)
    out = mlp_forward(x, weights, biases, meta)
    jax.block_until_ready(out)

    # Reference check in plain f32 JAX (same math as the PyTorch module).
    # Tolerance is loose because the kernel feeds the MXU bf16 operands
    # (with f32 accumulation).
    ref = x
    for i, (w, b) in enumerate(params):
        ref = ref @ w.T + b
        if i < len(params) - 1:
            ref = jnp.maximum(ref, 0.0)
    assert out.shape == (batch, output_size)
    assert jnp.allclose(out, ref, atol=1e-1, rtol=1e-1), (
        f"max abs err {jnp.max(jnp.abs(out - ref))}")

    print("KERNEL_OK")
</pallas_src>

<mosaic_0001>
module attributes {stable_mosaic.version = 11 : i64} {
  func.func @kernel(%arg0: i32, %arg1: memref<16x128xbf16, #tpu.memory_space<vmem>>, %arg2: memref<128x128xbf16, #tpu.memory_space<vmem>>, %arg3: memref<128x128xbf16, #tpu.memory_space<vmem>>, %arg4: memref<128x128xbf16, #tpu.memory_space<vmem>>, %arg5: memref<8x128xf32, #tpu.memory_space<vmem>>, %arg6: memref<16x128xf32, #tpu.memory_space<vmem>>) attributes {dimension_semantics = [#tpu.dimension_semantics<parallel>], iteration_bounds = array<i64: 1>, scalar_prefetch = 0 : i64, scratch_operands = 0 : i64, tpu.core_type = #tpu.core_type<tc>, window_params = [{transform_indices = @transform_0, window_bounds = array<i64: 16, 128>}, {pipeline_mode = #tpu.pipeline_mode<synchronous>, transform_indices = @transform_1, window_bounds = array<i64: 128, 128>}, {pipeline_mode = #tpu.pipeline_mode<synchronous>, transform_indices = @transform_2, window_bounds = array<i64: 128, 128>}, {pipeline_mode = #tpu.pipeline_mode<synchronous>, transform_indices = @transform_3, window_bounds = array<i64: 128, 128>}, {pipeline_mode = #tpu.pipeline_mode<synchronous>, transform_indices = @transform_4, window_bounds = array<i64: 8, 128>}, {transform_indices = @transform_5, window_bounds = array<i64: 16, 128>}]} {
    %c0 = arith.constant 0 : index
    %c0_0 = arith.constant 0 : index
    %0 = vector.load %arg1[%c0, %c0_0] : memref<16x128xbf16, #tpu.memory_space<vmem>>, vector<16x128xbf16>
    %c0_1 = arith.constant 0 : index
    %c0_2 = arith.constant 0 : index
    %1 = vector.load %arg2[%c0_1, %c0_2] : memref<128x128xbf16, #tpu.memory_space<vmem>>, vector<128x128xbf16>
    %cst = arith.constant dense<0.000000e+00> : vector<16x128xf32>
    %2 = tpu.matmul %0, %1, %cst {dimension_numbers = #tpu.dot_dimension_numbers<[1], [0], [0], [1], [0, 0, 1, 1], [], []>} : vector<16x128xbf16>, vector<128x128xbf16>, vector<16x128xf32> -> vector<16x128xf32>
    %c0_3 = arith.constant 0 : index
    %c0_4 = arith.constant 0 : index
    %3 = vector.load %arg5[%c0_3, %c0_4] : memref<8x128xf32, #tpu.memory_space<vmem>>, vector<1x128xf32>
    %4 = vector.broadcast %3 : vector<1x128xf32> to vector<16x128xf32>
    %5 = arith.addf %2, %4 : vector<16x128xf32>
    %cst_5 = arith.constant 0.000000e+00 : f32
    %6 = vector.broadcast %cst_5 : f32 to vector<16x128xf32>
    %7 = arith.maximumf %5, %6 : vector<16x128xf32>
    %8 = arith.truncf %7 : vector<16x128xf32> to vector<16x128xbf16>
    %c0_6 = arith.constant 0 : index
    %c0_7 = arith.constant 0 : index
    %9 = vector.load %arg3[%c0_6, %c0_7] : memref<128x128xbf16, #tpu.memory_space<vmem>>, vector<128x128xbf16>
    %cst_8 = arith.constant dense<0.000000e+00> : vector<16x128xf32>
    %10 = tpu.matmul %8, %9, %cst_8 {dimension_numbers = #tpu.dot_dimension_numbers<[1], [0], [0], [1], [0, 0, 1, 1], [], []>} : vector<16x128xbf16>, vector<128x128xbf16>, vector<16x128xf32> -> vector<16x128xf32>
    %c1 = arith.constant 1 : index
    %c0_9 = arith.constant 0 : index
    %11 = vector.load %arg5[%c1, %c0_9] : memref<8x128xf32, #tpu.memory_space<vmem>>, vector<1x128xf32>
    %12 = vector.broadcast %11 : vector<1x128xf32> to vector<16x128xf32>
    %13 = arith.addf %10, %12 : vector<16x128xf32>
    %cst_10 = arith.constant 0.000000e+00 : f32
    %14 = vector.broadcast %cst_10 : f32 to vector<16x128xf32>
    %15 = arith.maximumf %13, %14 : vector<16x128xf32>
    %16 = arith.truncf %15 : vector<16x128xf32> to vector<16x128xbf16>
    %c0_11 = arith.constant 0 : index
    %c0_12 = arith.constant 0 : index
    %17 = vector.load %arg4[%c0_11, %c0_12] : memref<128x128xbf16, #tpu.memory_space<vmem>>, vector<128x128xbf16>
    %cst_13 = arith.constant dense<0.000000e+00> : vector<16x128xf32>
    %18 = tpu.matmul %16, %17, %cst_13 {dimension_numbers = #tpu.dot_dimension_numbers<[1], [0], [0], [1], [0, 0, 1, 1], [], []>} : vector<16x128xbf16>, vector<128x128xbf16>, vector<16x128xf32> -> vector<16x128xf32>
    %c2 = arith.constant 2 : index
    %c0_14 = arith.constant 0 : index
    %19 = vector.load %arg5[%c2, %c0_14] : memref<8x128xf32, #tpu.memory_space<vmem>>, vector<1x128xf32>
    %20 = vector.broadcast %19 : vector<1x128xf32> to vector<16x128xf32>
    %21 = arith.addf %18, %20 : vector<16x128xf32>
    %c0_15 = arith.constant 0 : index
    %c0_16 = arith.constant 0 : index
    %22 = vector.load %arg6[%c0_15, %c0_16] : memref<16x128xf32, #tpu.memory_space<vmem>>, vector<16x128xf32>
    tpu.vector_store %arg6[%c0_15, %c0_16], %21 {strides = array<i32>} : memref<16x128xf32, #tpu.memory_space<vmem>>, vector<16x128xf32>,
    return
  }
  func.func @transform_0(%arg0: i32) -> (i32, i32) {
    %c0_i32 = arith.constant 0 : i32
    %c0_i32_0 = arith.constant 0 : i32
    return %arg0, %c0_i32 : i32, i32
  }
  func.func @transform_1(%arg0: i32) -> (i32, i32) {
    %c0_i32 = arith.constant 0 : i32
    %c0_i32_0 = arith.constant 0 : i32
    %c0_i32_1 = arith.constant 0 : i32
    return %c0_i32, %c0_i32_0 : i32, i32
  }
  func.func @transform_2(%arg0: i32) -> (i32, i32) {
    %c0_i32 = arith.constant 0 : i32
    %c0_i32_0 = arith.constant 0 : i32
    %c0_i32_1 = arith.constant 0 : i32
    return %c0_i32, %c0_i32_0 : i32, i32
  }
  func.func @transform_3(%arg0: i32) -> (i32, i32) {
    %c0_i32 = arith.constant 0 : i32
    %c0_i32_0 = arith.constant 0 : i32
    %c0_i32_1 = arith.constant 0 : i32
    return %c0_i32, %c0_i32_0 : i32, i32
  }
  func.func @transform_4(%arg0: i32) -> (i32, i32) {
    %c0_i32 = arith.constant 0 : i32
    %c0_i32_0 = arith.constant 0 : i32
    %c0_i32_1 = arith.constant 0 : i32
    return %c0_i32, %c0_i32_0 : i32, i32
  }
  func.func @transform_5(%arg0: i32) -> (i32, i32) {
    %c0_i32 = arith.constant 0 : i32
    %c0_i32_0 = arith.constant 0 : i32
    return %arg0, %c0_i32 : i32, i32
  }
}

</mosaic_0001>

<bundles_post_ra>
// kernel: mlp_forward.1
= control target key start
LH: loop header
LB: loop body
LE: loop exit
PB: predicated region body
PF: predicated region fallthrough
CT: control target
= control target key end

     0   :  { %10 = vsyncpa [#allocation3], 0  ;;  %s768_s0 = inlined_call_operand.vmem [shape: bf16[16,128], index: 0, kind: input, shape index: {}]   ;;  %s769_s1 = inlined_call_operand.hbm [shape: bf16[128,128], index: 1, kind: input, shape index: {}]   ;;  %s770_s2 = inlined_call_operand.hbm [shape: bf16[128,128], index: 2, kind: input, shape index: {}]   ;;  %s771_s3 = inlined_call_operand.hbm [shape: bf16[128,128], index: 3, kind: input, shape index: {}]   ;;  %s772_s4 = inlined_call_operand.vmem [shape: f32[8,128], index: 4, kind: input, shape index: {}]   ;;  %s773_s5 = inlined_call_operand.vmem [shape: f32[16,128], index: 5, kind: output, shape index: {}]  }
   0x1   :  { %11 = vsyncpa [#allocation5], 0  ;;  %s631_s18 = smov [#allocation4]   ;;  %s632_s20 = smov [#allocation2]  }
   0x2   :  { %s31_s19 = sshll.u32 %s631_s18, 4  ;;  %s19_s21 = sshll.u32 %s632_s20, 4  ;;  %s32_s19 = int_to_ptr.vmem [resolvable:$true] %s31_s19  ;;  %s668_s21 = int_to_ptr.vmem [resolvable:$true] %s19_s21 }
   0x3   :  { %s561_s24 = scalar_lea.hbm %s770_s2, 1024 }
   0x4   :  { %p562_p0 = scmp.ne.s32.totalorder %s770_s2, %s561_s24  ;;  %p565_p1 = scmp.lt.u32.totalorder %s561_s24, %s770_s2 }
   0x6   :  { %p567_p2 = pnand %p565_p1, %p562_p0 }
   0x8   :  { %570 = shalt.err (!%p567_p2)
}
   0x9   :  { %s571_s29 = scalar_lea.vmem %s32_s19, 1024  ;;  %p576_p4 = scmp.lt.s32.totalorder %s32_s19, %s32_s19 }
   0xa   :  { %p572_p3 = scmp.ne.s32.totalorder %s32_s19, %s571_s29  ;;  %p577_p5 = scmp.lt.s32.totalorder %s571_s29, %s571_s29 }
   0xc   :  { %p578_p6 = por %p577_p5, %p576_p4 }
   0xe   :  { %p579_p7 = pnand %p578_p6, %p572_p3 }
  0x10   :  { %582 = shalt.err (!%p579_p7)
}
  0x11   :  { %s633_s30 = smov 64   ;;  %s634_s6 = smov 4  }
  0x12   :  { %37 = dma.hbm_to_vmem [thread:$0]  %s770_s2, 1024, %s32_s19, [#allocation5], %s633_s30, %s633_s30, %s634_s6  }
  0x13   :  { %s583_s11 = scalar_lea.hbm %s769_s1, 1024 }
  0x14   :  { %p584_p8 = scmp.ne.s32.totalorder %s769_s1, %s583_s11  ;;  %p587_p9 = scmp.lt.u32.totalorder %s583_s11, %s769_s1 }
  0x16   :  { %p589_p10 = pnand %p587_p9, %p584_p8 }
  0x18   :  { %592 = shalt.err (!%p589_p10)
}
  0x19   :  { %s593_s16 = scalar_lea.vmem %s668_s21, 1024  ;;  %p598_p12 = scmp.lt.s32.totalorder %s668_s21, %s668_s21 }
  0x1a   :  { %p594_p11 = scmp.ne.s32.totalorder %s668_s21, %s593_s16  ;;  %p599_p13 = scmp.lt.s32.totalorder %s593_s16, %s593_s16 }
  0x1c   :  { %p600_p0 = por %p599_p13, %p598_p12 }
  0x1e   :  { %p601_p1 = pnand %p600_p0, %p594_p11 }
  0x20   :  { %604 = shalt.err (!%p601_p1)
}
  0x21   :  { %25 = dma.hbm_to_vmem [thread:$0]  %s769_s1, 1024, %s668_s21, [#allocation3], %s633_s30, %s633_s30, %s634_s6  }
  0x22   :  { %s635_s18 = smov [#allocation6]   ;;  %s605_s23 = scalar_lea.hbm %s771_s3, 1024 }
  0x23   :  { %s43_s19 = sshll.u32 %s635_s18, 4  ;;  %p606_p2 = scmp.ne.s32.totalorder %s771_s3, %s605_s23  ;;  %s44_s19 = int_to_ptr.vmem [resolvable:$true] %s43_s19 }
  0x24   :  { %p609_p3 = scmp.lt.u32.totalorder %s605_s23, %s771_s3 }
  0x26   :  { %p611_p4 = pnand %p609_p3, %p606_p2 }
  0x28   :  { %614 = shalt.err (!%p611_p4)
}
  0x29   :  { %s615_s28 = scalar_lea.vmem %s44_s19, 1024  ;;  %p620_p6 = scmp.lt.s32.totalorder %s44_s19, %s44_s19 }
  0x2a   :  { %p616_p5 = scmp.ne.s32.totalorder %s44_s19, %s615_s28  ;;  %p621_p7 = scmp.lt.s32.totalorder %s615_s28, %s615_s28 }
  0x2c   :  { %p622_p8 = por %p621_p7, %p620_p6 }
  0x2e   :  { %p623_p9 = pnand %p622_p8, %p616_p5 }
  0x30   :  { %626 = shalt.err (!%p623_p9)
}
  0x31   :  { %49 = dma.hbm_to_vmem [thread:$0]  %s771_s3, 1024, %s44_s19, [#allocation5], %s633_s30, %s633_s30, %s634_s6  }
  0x32   :  { %627 = dma.done.wait [#allocation3], 1024  }
  0x33   :  { %628 = vsyncadd [#allocation3], 4294966272 }
  0x34   :  { %629 = dma.done.wait [#allocation5], 2048  }
  0x35   :  { %630 = vsyncadd [#allocation5], 4294965248  ;;  %v636_v0 = vmov 0.0   ;;  %vm637_vm0 = vmmov 0   ;;  %v536_v1 = vld [vmem:[#allocation2] sm:$0xff]   ;;  %v537_v2 = vld [vmem:[#allocation2 + $0x8] sm:$0xff]  }
  0x36   :  { %469 = vmatprep.subr.bf16.mxu0 %v636_v0  ;;  %485 = vmatprep.mubr.msk.bf16.mxu0 %vm637_vm0, %v636_v0  ;;  %v538_v3 = vld [vmem:[#allocation2 + $0x10] sm:$0xff]   ;;  %v545_v4 = vld [vmem:[#allocation4] sm:$0xff]   ;;  %v539_v5 = vld [vmem:[#allocation2 + $0x18] sm:$0xff]  }
  0x37   :  { %489 = vmatprep.subr.bf16.mxu1 %v636_v0  ;;  %505 = vmatprep.mubr.msk.bf16.mxu1 %vm637_vm0, %v636_v0  ;;  %v546_v6 = vld [vmem:[#allocation4 + $0x8] sm:$0xff]   ;;  %v540_v7 = vld [vmem:[#allocation2 + $0x20] sm:$0xff]   ;;  %v547_v8 = vld [vmem:[#allocation4 + $0x10] sm:$0xff]  }
  0x38   :  { %470 = vmatpush3.bf16.msra.mxu0 %v536_v1  ;;  %490 = vmatpush3.bf16.msra.mxu1 %v545_v4  ;;  %v541_v9 = vld [vmem:[#allocation2 + $0x28] sm:$0xff]   ;;  %v548_v10 = vld [vmem:[#allocation4 + $0x18] sm:$0xff]   ;;  %v542_v11 = vld [vmem:[#allocation2 + $0x30] sm:$0xff]  }
  0x39   :  { %471 = vmatprep.subr.bf16.mxu0 %v636_v0  ;;  %491 = vmatprep.subr.bf16.mxu1 %v636_v0  ;;  %v549_v12 = vld [vmem:[#allocation4 + $0x20] sm:$0xff]   ;;  %v543_v13 = vld [vmem:[#allocation2 + $0x38] sm:$0xff]   ;;  %v550_v14 = vld [vmem:[#allocation4 + $0x28] sm:$0xff]  }
  0x3a   :  { %v544_v15 = vld [vmem:[%s768_s0] sm:$0xff]   ;;  %v551_v16 = vld [vmem:[#allocation4 + $0x30] sm:$0xff]   ;;  %v552_v17 = vld [vmem:[#allocation4 + $0x38] sm:$0xff]  }
  0x3b   :  { %v553_v18 = vld [vmem:[#allocation6] sm:$0xff]   ;;  %v554_v19 = vld [vmem:[#allocation6 + $0x8] sm:$0xff]   ;;  %v555_v20 = vld [vmem:[#allocation6 + $0x10] sm:$0xff]  }
  0x3c   :  { %472 = vmatpush3.bf16.msra.mxu0 %v537_v2  ;;  %492 = vmatpush3.bf16.msra.mxu1 %v546_v6  ;;  %v556_v21 = vld [vmem:[#allocation6 + $0x18] sm:$0xff]   ;;  %v557_v22 = vld [vmem:[#allocation6 + $0x20] sm:$0xff]   ;;  %v558_v23 = vld [vmem:[#allocation6 + $0x28] sm:$0xff]  }
  0x3d   :  { %473 = vmatprep.subr.bf16.mxu0 %v636_v0  ;;  %493 = vmatprep.subr.bf16.mxu1 %v636_v0  ;;  %v414_v24 = vld [vmem:[%s772_s4] ss:$0 sm:$0xff]  ;;  %v559_v34 = vld [vmem:[#allocation6 + $0x30] sm:$0xff]   ;;  %v560_v35 = vld [vmem:[#allocation6 + $0x38] sm:$0xff]  }
  0x3e   :  { %v424_v36 = vld [vmem:[%s772_s4 + $0x1] ss:$0 sm:$0xff]  ;;  %v433_v46 = vld [vmem:[%s772_s4 + $0x2] ss:$0 sm:$0xff] }
  0x40   :  { %474 = vmatpush3.bf16.msra.mxu0 %v538_v3  ;;  %494 = vmatpush3.bf16.msra.mxu1 %v547_v8 }
  0x41   :  { %475 = vmatprep.subr.bf16.mxu0 %v636_v0  ;;  %495 = vmatprep.subr.bf16.mxu1 %v636_v0 }
  0x44   :  { %476 = vmatpush3.bf16.msra.mxu0 %v539_v5  ;;  %496 = vmatpush3.bf16.msra.mxu1 %v548_v10 }
  0x45   :  { %477 = vmatprep.subr.bf16.mxu0 %v636_v0  ;;  %497 = vmatprep.subr.bf16.mxu1 %v636_v0 }
  0x48   :  { %478 = vmatpush3.bf16.msra.mxu0 %v540_v7  ;;  %498 = vmatpush3.bf16.msra.mxu1 %v549_v12 }
  0x49   :  { %479 = vmatprep.subr.bf16.mxu0 %v636_v0  ;;  %499 = vmatprep.subr.bf16.mxu1 %v636_v0 }
  0x4c   :  { %480 = vmatpush3.bf16.msra.mxu0 %v541_v9  ;;  %500 = vmatpush3.bf16.msra.mxu1 %v550_v14 }
  0x4d   :  { %481 = vmatprep.subr.bf16.mxu0 %v636_v0  ;;  %501 = vmatprep.subr.bf16.mxu1 %v636_v0 }
  0x50   :  { %482 = vmatpush3.bf16.msra.mxu0 %v542_v11  ;;  %502 = vmatpush3.bf16.msra.mxu1 %v551_v16 }
  0x51   :  { %483 = vmatprep.subr.bf16.mxu0 %v636_v0  ;;  %503 = vmatprep.subr.bf16.mxu1 %v636_v0 }
  0x54   :  { %484 = vmatpush3.bf16.msra.mxu0 %v543_v13  ;;  %504 = vmatpush3.bf16.msra.mxu1 %v552_v17 }
  0x55   :  { %509 = vmatprep.subr.bf16.mxu0 %v636_v0 }
  0x57   :  { %486 = vmatmul.mubr.bf16.vlgmr.msra.gmra.mrb[0].mxu0 %v544_v15 }
  0x58   :  { %525 = vmatprep.mubr.msk.bf16.mxu0 %vm637_vm0, %v636_v0  ;;  %510 = vmatpush3.bf16.msra.mxu0 %v553_v18 }
  0x59   :  { %511 = vmatprep.subr.bf16.mxu0 %v636_v0 }
  0x5c   :  { %512 = vmatpush3.bf16.msra.mxu0 %v554_v19 }
  0x5d   :  { %513 = vmatprep.subr.bf16.mxu0 %v636_v0 }
  0x60   :  { %514 = vmatpush3.bf16.msra.mxu0 %v555_v20 }
  0x61   :  { %515 = vmatprep.subr.bf16.mxu0 %v636_v0 }
  0x64   :  { %516 = vmatpush3.bf16.msra.mxu0 %v556_v21 }
  0x65   :  { %517 = vmatprep.subr.bf16.mxu0 %v636_v0 }
  0x68   :  { %518 = vmatpush3.bf16.msra.mxu0 %v557_v22 }
  0x69   :  { %519 = vmatprep.subr.bf16.mxu0 %v636_v0 }
  0x6c   :  { %520 = vmatpush3.bf16.msra.mxu0 %v558_v23 }
  0x6d   :  { %521 = vmatprep.subr.bf16.mxu0 %v636_v0 }
  0x70   :  { %522 = vmatpush3.bf16.msra.mxu0 %v559_v34 }
  0x71   :  { %523 = vmatprep.subr.bf16.mxu0 %v636_v0 }
  0x74   :  { %524 = vmatpush3.bf16.msra.mxu0 %v560_v35 }
 0x12a   :  { %v173_v25 = vpop.f32.mrb[0].mxu0 }
 0x12b   :  { %v174_v26 = vadd.f32 %v414_v24, %v173_v25  ;;  %v487_v27 = vpop.f32.mrb[1].mxu0 }
 0x12c   :  { %v176_v28 = vpop.f32.mrb[2].mxu0 }
 0x12d   :  { %v177_v29 = vadd.f32 %v414_v24, %v176_v28  ;;  %v488_v30 = vpop.f32.mrb[3].mxu0  ;;  %v180_v31 = vmax.f32 %v174_v26, 0.0 }
 0x12f   :  { %v181_v32 = vmax.f32 %v177_v29, 0.0 }
 0x131   :  { %v182_v33 = vpack.c.bf16 %v181_v32, %v180_v31 }
 0x133   :  { %506 = vmatmul.mubr.bf16.vlgmr.msra.gmra.mrb[0].mxu1 %v182_v33 }
 0x206   :  { %v286_v37 = vpop.f32.mrb[0].mxu1 }
 0x207   :  { %v287_v38 = vadd.f32 %v424_v36, %v286_v37  ;;  %v507_v39 = vpop.f32.mrb[1].mxu1 }
 0x208   :  { %v289_v40 = vpop.f32.mrb[2].mxu1 }
 0x209   :  { %v290_v41 = vadd.f32 %v424_v36, %v289_v40  ;;  %v508_v42 = vpop.f32.mrb[3].mxu1  ;;  %v293_v43 = vmax.f32 %v287_v38, 0.0 }
 0x20b   :  { %v294_v44 = vmax.f32 %v290_v41, 0.0 }
 0x20d   :  { %v295_v45 = vpack.c.bf16 %v294_v44, %v293_v43 }
 0x20f   :  { %526 = vmatmul.mubr.bf16.vlgmr.msra.gmra.mrb[4].mxu0 %v295_v45 }
 0x2e2   :  { %v399_v47 = vpop.f32.mrb[4].mxu0 }
 0x2e3   :  { %v400_v48 = vadd.f32 %v433_v46, %v399_v47  ;;  %v527_v49 = vpop.f32.mrb[5].mxu0 }
 0x2e4   :  { %v402_v50 = vpop.f32.mrb[6].mxu0 }
 0x2e5   :  { %406 = vst [vmem:[%s773_s5] sm:$0xff] %v400_v48  ;;  %v403_v51 = vadd.f32 %v433_v46, %v402_v50  ;;  %v528_v52 = vpop.f32.mrb[7].mxu0 }
 0x2e7   :  { %407 = vst [vmem:[%s773_s5 + $0x8] sm:$0xff] %v403_v51 }
 0x2e8   :  { %412 = vsyncpa [#allocation3], 1 }
 0x2e9   :  { %413 = vsyncpa [#allocation5], 1 }

</bundles_post_ra>
